<compile_context>
chip_gen: v5e
topology: v5e:2x2
jax: 0.10.0
libtpu: 0.0.40
codegen_flags: <defaults>
</compile_context>

<pallas_src>
import functools

import jax
import jax.numpy as jnp
from jax import lax
from jax.experimental import pallas as pl
from jax.experimental.pallas import tpu as pltpu


def _round_up(x, m):
    return ((x + m - 1) // m) * m


# ----------------------------------------------------------------------------
# Pallas kernel: fused (N,K)x(K,TM) matmul + bias (+ optional ReLU).
# Output tile is (N, TM) with TM a multiple of 128 -> lane-dense stores.
# ----------------------------------------------------------------------------
def _mm_bias_kernel(w_ref, p_ref, b_ref, o_ref, *, relu):
    acc = jnp.dot(w_ref[...], p_ref[...], preferred_element_type=jnp.float32)
    acc = acc + b_ref[...]                       # (N, 1) broadcasts over M columns
    if relu:
        acc = jnp.maximum(acc, 0.0)
    o_ref[...] = acc.astype(o_ref.dtype)


def pallas_matmul_bias_t(w, p, b, *, relu, tm=512):
    """out = w @ p + b[:, None] (optionally ReLU).

    w: (N, K)  p: (K, M)  b: (N,)  ->  (N, M) float32.
    M is tiled along a 'parallel' grid axis; operands go to the MXU as bf16 with
    f32 accumulation.
    """
    N, K = w.shape
    Kp, M = p.shape
    assert K == Kp, (K, Kp)

    # Tile M (lane dim). Pad M to a multiple of the tile so every store is full-width.
    if M <= tm:
        tm_eff = _round_up(max(M, 1), 128)
        m_pad = tm_eff
    else:
        tm_eff = tm
        m_pad = _round_up(M, tm_eff)
    if m_pad != M:
        p = jnp.pad(p, ((0, 0), (0, m_pad - M)))

    w_bf = w.astype(jnp.bfloat16)
    p_bf = p.astype(jnp.bfloat16)
    b2 = b.reshape(N, 1).astype(jnp.float32)

    grid = (m_pad // tm_eff,)
    cost = pl.CostEstimate(
        flops=2 * m_pad * K * N,
        transcendentals=0,
        bytes_accessed=(K * m_pad * 2) + (N * K * 2) + (N * 4) + (N * m_pad * 4),
    )

    kernel = functools.partial(_mm_bias_kernel, relu=relu)
    out = pl.pallas_call(
        kernel,
        out_shape=jax.ShapeDtypeStruct((N, m_pad), jnp.float32),
        grid=grid,
        in_specs=[
            pl.BlockSpec((N, K), lambda i: (0, 0)),        # weights resident
            pl.BlockSpec((K, tm_eff), lambda i: (0, i)),   # stream M tiles
            pl.BlockSpec((N, 1), lambda i: (0, 0)),        # bias resident
        ],
        out_specs=pl.BlockSpec((N, tm_eff), lambda i: (0, i)),
        compiler_params=pltpu.CompilerParams(
            dimension_semantics=("parallel",)),
        cost_estimate=cost,
    )(w_bf, p_bf, b2)
    return out[:, :M]


# ----------------------------------------------------------------------------
# Conv3d = im2col (JAX glue, transposed so K x M comes out directly) + Pallas matmul.
# ----------------------------------------------------------------------------
def conv3d(x, w, b, *, stride, padding, relu):
    """x:(B,Cin,D,H,W)  w:(Cout,Cin,KD,KH,KW)  b:(Cout,)  dilation == 1."""
    B, Cin, D, H, W = x.shape
    Cout, _, KD, KH, KW = w.shape
    sd, sh, sw = stride
    pd, ph, pw = padding

    xp = jnp.pad(x, ((0, 0), (0, 0), (pd, pd), (ph, ph), (pw, pw)))
    Dp, Hp, Wp = D + 2 * pd, H + 2 * ph, W + 2 * pw
    Do = (Dp - KD) // sd + 1
    Ho = (Hp - KH) // sh + 1
    Wo = (Wp - KW) // sw + 1

    patches = []
    for kd in range(KD):
        for kh in range(KH):
            for kw in range(KW):
                patches.append(
                    xp[:, :,
                       kd: kd + (Do - 1) * sd + 1: sd,
                       kh: kh + (Ho - 1) * sh + 1: sh,
                       kw: kw + (Wo - 1) * sw + 1: sw])
    # (Ktap, B, Cin, Do, Ho, Wo) -> (Cin, Ktap, B, Do, Ho, Wo) -> (K, M)
    p = jnp.stack(patches, axis=0)
    p = p.transpose(2, 0, 1, 3, 4, 5).reshape(Cin * KD * KH * KW, B * Do * Ho * Wo)

    wm = w.reshape(Cout, Cin * KD * KH * KW)               # (N, K)
    y = pallas_matmul_bias_t(wm, p, b, relu=relu)          # (N, M)
    y = y.reshape(Cout, B, Do, Ho, Wo).transpose(1, 0, 2, 3, 4)
    return y


# ----------------------------------------------------------------------------
# Parameter init (deterministic, mimics kaiming_normal_ + zero bias).
# ----------------------------------------------------------------------------
def kaiming_conv(key, cout, cin, kd, kh, kw):
    fan_in = cin * kd * kh * kw
    std = (2.0 / fan_in) ** 0.5
    w = jax.random.normal(key, (cout, cin, kd, kh, kw), jnp.float32) * std
    b = jnp.zeros((cout,), jnp.float32)
    return w, b


def kaiming_linear(key, out_f, in_f):
    std = (2.0 / in_f) ** 0.5
    w = jax.random.normal(key, (out_f, in_f), jnp.float32) * std
    b = jnp.zeros((out_f,), jnp.float32)
    return w, b


def init_params(key, input_channels, n_classes, patch_size=5):
    ks = jax.random.split(key, 7)
    params = {}
    params["conv1"] = kaiming_conv(ks[0], 20, 1, 3, 3, 3)
    params["pool1"] = kaiming_conv(ks[1], 20, 20, 3, 1, 1)
    params["conv2"] = kaiming_conv(ks[2], 35, 20, 3, 3, 3)
    params["pool2"] = kaiming_conv(ks[3], 35, 35, 3, 1, 1)
    params["conv3"] = kaiming_conv(ks[4], 35, 35, 3, 1, 1)
    params["conv4"] = kaiming_conv(ks[5], 35, 35, 2, 1, 1)

    # Infer flattened feature size exactly like _get_final_flattened_size().
    conv1_pad = (1, 1, 1) if patch_size == 3 else (0, 0, 0)
    dummy = jnp.zeros((1, 1, input_channels, patch_size, patch_size), jnp.float32)
    t = conv3d(dummy, *params["conv1"], stride=(1, 1, 1), padding=conv1_pad, relu=False)
    t = conv3d(t, *params["pool1"], stride=(2, 1, 1), padding=(1, 0, 0), relu=False)
    t = conv3d(t, *params["conv2"], stride=(1, 1, 1), padding=(1, 0, 0), relu=False)
    t = conv3d(t, *params["pool2"], stride=(2, 1, 1), padding=(1, 0, 0), relu=False)
    t = conv3d(t, *params["conv3"], stride=(1, 1, 1), padding=(1, 0, 0), relu=False)
    t = conv3d(t, *params["conv4"], stride=(2, 1, 1), padding=(1, 0, 0), relu=False)
    features_size = int(t.shape[1] * t.shape[2] * t.shape[3] * t.shape[4])

    params["fc"] = kaiming_linear(ks[6], n_classes, features_size)
    return params, features_size, conv1_pad


# ----------------------------------------------------------------------------
# Forward pass (matches HamidaEtAl.forward; dropout = identity/eval).
# ----------------------------------------------------------------------------
def hamida_forward(params, x, features_size, conv1_pad):
    x = conv3d(x, *params["conv1"], stride=(1, 1, 1), padding=conv1_pad, relu=True)
    x = conv3d(x, *params["pool1"], stride=(2, 1, 1), padding=(1, 0, 0), relu=False)
    x = conv3d(x, *params["conv2"], stride=(1, 1, 1), padding=(1, 0, 0), relu=True)
    x = conv3d(x, *params["pool2"], stride=(2, 1, 1), padding=(1, 0, 0), relu=False)
    x = conv3d(x, *params["conv3"], stride=(1, 1, 1), padding=(1, 0, 0), relu=True)
    x = conv3d(x, *params["conv4"], stride=(2, 1, 1), padding=(1, 0, 0), relu=True)
    x = x.reshape(-1, features_size)             # same C-order flatten as torch .view
    # dropout: identity in eval mode
    fc_w, fc_b = params["fc"]                    # (n_classes, features)
    y = pallas_matmul_bias_t(fc_w, x.T, fc_b, relu=False)   # (n_classes, B)
    return y.T


# ----------------------------------------------------------------------------
# Pure-JAX reference with matching bf16-operand / f32-accumulate quantization.
# ----------------------------------------------------------------------------
def ref_conv3d(x, w, b, *, stride, padding, relu):
    y = lax.conv_general_dilated(
        x.astype(jnp.bfloat16), w.astype(jnp.bfloat16),
        window_strides=stride,
        padding=[(padding[0], padding[0]), (padding[1], padding[1]),
                 (padding[2], padding[2])],
        dimension_numbers=("NCDHW", "OIDHW", "NCDHW"),
        preferred_element_type=jnp.float32)
    y = y + b.reshape(1, -1, 1, 1, 1)
    return jnp.maximum(y, 0.0) if relu else y


def ref_forward(params, x, features_size, conv1_pad):
    x = ref_conv3d(x, *params["conv1"], stride=(1, 1, 1), padding=conv1_pad, relu=True)
    x = ref_conv3d(x, *params["pool1"], stride=(2, 1, 1), padding=(1, 0, 0), relu=False)
    x = ref_conv3d(x, *params["conv2"], stride=(1, 1, 1), padding=(1, 0, 0), relu=True)
    x = ref_conv3d(x, *params["pool2"], stride=(2, 1, 1), padding=(1, 0, 0), relu=False)
    x = ref_conv3d(x, *params["conv3"], stride=(1, 1, 1), padding=(1, 0, 0), relu=True)
    x = ref_conv3d(x, *params["conv4"], stride=(2, 1, 1), padding=(1, 0, 0), relu=True)
    x = x.reshape(-1, features_size)
    fc_w, fc_b = params["fc"]
    y = jnp.dot(x.astype(jnp.bfloat16), fc_w.T.astype(jnp.bfloat16),
                preferred_element_type=jnp.float32) + fc_b
    return y


if __name__ == "__main__":
    BATCH = 2
    INPUT_CHANNELS = 16   # spectral bands (depth D of the 3-D conv)
    PATCH_SIZE = 5
    N_CLASSES = 10

    key = jax.random.PRNGKey(0)
    pkey, xkey = jax.random.split(key)

    params, features_size, conv1_pad = init_params(
        pkey, INPUT_CHANNELS, N_CLASSES, PATCH_SIZE)

    # PyTorch input layout: (B, 1, input_channels, patch, patch)
    x = jax.random.normal(
        xkey, (BATCH, 1, INPUT_CHANNELS, PATCH_SIZE, PATCH_SIZE), jnp.float32)

    fwd = jax.jit(hamida_forward, static_argnums=(2, 3))
    out = jax.block_until_ready(fwd(params, x, features_size, conv1_pad))
    assert out.shape == (BATCH, N_CLASSES), out.shape

    ref = jax.block_until_ready(ref_forward(params, x, features_size, conv1_pad))
    max_err = float(jnp.abs(out - ref).max())
    assert jnp.allclose(out, ref, atol=2e-2, rtol=2e-2), max_err

    print("KERNEL_OK")
</pallas_src>

<mosaic_0001>
module attributes {stable_mosaic.version = 11 : i64} {
  func.func @_mm_bias_kernel(%arg0: i32, %arg1: memref<20x27xbf16, #tpu.memory_space<vmem>>, %arg2: memref<27x128xbf16, #tpu.memory_space<vmem>>, %arg3: memref<20x1xf32, #tpu.memory_space<vmem>>, %arg4: memref<20x128xf32, #tpu.memory_space<vmem>>) attributes {dimension_semantics = [#tpu.dimension_semantics<parallel>], iteration_bounds = array<i64: 1>, scalar_prefetch = 0 : i64, scratch_operands = 0 : i64, tpu.core_type = #tpu.core_type<tc>, window_params = [{pipeline_mode = #tpu.pipeline_mode<synchronous>, transform_indices = @transform_0, window_bounds = array<i64: 20, 27>}, {transform_indices = @transform_1, window_bounds = array<i64: 27, 128>}, {pipeline_mode = #tpu.pipeline_mode<synchronous>, transform_indices = @transform_2, window_bounds = array<i64: 20, 1>}, {transform_indices = @transform_3, window_bounds = array<i64: 20, 128>}]} {
    %c0 = arith.constant 0 : index
    %c0_0 = arith.constant 0 : index
    %0 = vector.load %arg1[%c0, %c0_0] : memref<20x27xbf16, #tpu.memory_space<vmem>>, vector<20x27xbf16>
    %c0_1 = arith.constant 0 : index
    %c0_2 = arith.constant 0 : index
    %1 = vector.load %arg2[%c0_1, %c0_2] : memref<27x128xbf16, #tpu.memory_space<vmem>>, vector<27x128xbf16>
    %cst = arith.constant dense<0.000000e+00> : vector<20x128xf32>
    %2 = tpu.matmul %0, %1, %cst {dimension_numbers = #tpu.dot_dimension_numbers<[1], [0], [0], [1], [0, 0, 1, 1], [], []>} : vector<20x27xbf16>, vector<27x128xbf16>, vector<20x128xf32> -> vector<20x128xf32>
    %c0_3 = arith.constant 0 : index
    %c0_4 = arith.constant 0 : index
    %3 = vector.load %arg3[%c0_3, %c0_4] : memref<20x1xf32, #tpu.memory_space<vmem>>, vector<20x1xf32>
    %4 = vector.broadcast %3 : vector<20x1xf32> to vector<20x128xf32>
    %5 = arith.addf %2, %4 : vector<20x128xf32>
    %c0_5 = arith.constant 0 : index
    %c0_6 = arith.constant 0 : index
    %6 = vector.load %arg4[%c0_5, %c0_6] : memref<20x128xf32, #tpu.memory_space<vmem>>, vector<20x128xf32>
    tpu.vector_store %arg4[%c0_5, %c0_6], %5 {strides = array<i32>} : memref<20x128xf32, #tpu.memory_space<vmem>>, vector<20x128xf32>,
    return
  }
  func.func @transform_0(%arg0: i32) -> (i32, i32) {
    %c0_i32 = arith.constant 0 : i32
    %c0_i32_0 = arith.constant 0 : i32
    %c0_i32_1 = arith.constant 0 : i32
    return %c0_i32, %c0_i32_0 : i32, i32
  }
  func.func @transform_1(%arg0: i32) -> (i32, i32) {
    %c0_i32 = arith.constant 0 : i32
    %c0_i32_0 = arith.constant 0 : i32
    return %c0_i32, %arg0 : i32, i32
  }
  func.func @transform_2(%arg0: i32) -> (i32, i32) {
    %c0_i32 = arith.constant 0 : i32
    %c0_i32_0 = arith.constant 0 : i32
    %c0_i32_1 = arith.constant 0 : i32
    return %c0_i32, %c0_i32_0 : i32, i32
  }
  func.func @transform_3(%arg0: i32) -> (i32, i32) {
    %c0_i32 = arith.constant 0 : i32
    %c0_i32_0 = arith.constant 0 : i32
    return %c0_i32, %arg0 : i32, i32
  }
}

</mosaic_0001>

<bundles_post_ra>
// kernel: tpu_custom_call.1
= control target key start
LH: loop header
LB: loop body
LE: loop exit
PB: predicated region body
PF: predicated region fallthrough
CT: control target
= control target key end

     0   :  { %8 = vsyncpa [#allocation3], 0  ;;  %s263_s0 = inlined_call_operand.hbm [shape: bf16[20,27], index: 0, kind: input, shape index: {}]   ;;  %s264_s1 = inlined_call_operand.vmem [shape: bf16[27,128], index: 1, kind: input, shape index: {}]   ;;  %s265_s2 = inlined_call_operand.vmem [shape: f32[20,1], index: 2, kind: input, shape index: {}]   ;;  %s266_s3 = inlined_call_operand.hbm [shape: f32[20,128], index: 3, kind: output, shape index: {}]  }
   0x1   :  { %9 = vsyncpa [#allocation4], 0  ;;  %s14_s14 = sshll.u32 %s263_s0, 4  ;;  %s211_s15 = smov [#allocation2]   ;;  %s15_s14 = int_to_ptr.hbm [resolvable:$true] %s14_s14 }
   0x2   :  { %s16_s16 = sshll.u32 %s211_s15, 4  ;;  %s212_s17 = smov 64   ;;  %s17_s16 = int_to_ptr.vmem [resolvable:$true] %s16_s16 }
   0x3   :  { %s213_s18 = smov 4  }
   0x4   :  { %22 = dma.hbm_to_vmem [thread:$0]  %s15_s14, 192, %s17_s16, [#allocation3], %s212_s17, %s212_s17, %s213_s18  }
   0x5   :  { %207 = dma.done.wait [#allocation3], 192  }
   0x6   :  { %208 = vsyncadd [#allocation3], 4294967104  ;;  %vm83_vm0 = vcmask 1044480   ;;  %v214_v0 = vmov 0   ;;  %vm84_vm1 = vcmask 1045504   ;;  %v215_v1 = vmov 65535  }
   0x7   :  { %157 = vset.pattern.permute.xlu0 %v214_v0  ;;  %158 = vset.pattern.permute.xlu1 %v214_v0  ;;  %v85_v2 = vsel %vm83_vm0, 4294967295, %v215_v1  ;;  %v140_v3 = vld [vmem:[%s264_s1 + $0x8] sm:$0xf]  ;;  %v146_v4 = vld [vmem:[%s264_s1 + $0x8] sm:$0x30]  ;;  %v39_v8 = vld [vmem:[%s265_s2] sm:$0xff] }
   0x8   :  { %v86_v5 = vsel %vm84_vm1, %v85_v2, 0  ;;  %v141_v6 = vor.u32 %v146_v4, %v140_v3  ;;  %v34_v7 = vld [vmem:[#allocation2 + $0x8] sm:$0x3]  ;;  %44 = vperm.xlu0 %157, %v39_v8   ;;  %v41_v9 = vld [vmem:[%s265_s2 + $0x10] sm:$0xf]  ;;  %v145_v12 = vld [vmem:[%s264_s1] sm:$0xff] }
   0x9   :  { %54 = vperm.xlu1 %158, %v41_v9   ;;  %v62_v11 = vunpack.c.l.b16 %v34_v7  ;;  %v40_v13 = vld [vmem:[%s265_s2 + $0x8] sm:$0xff]  ;;  %v144_v14 = vld [vmem:[#allocation2] sm:$0xff]  ;;  %vm76_vm2 = vcmask 220160   ;;  %s216_s1 = smov [#allocation5]   ;;  %s117_s5 = sshll.u32 %s266_s3, 4  ;;  %s118_s5 = int_to_ptr.hbm [resolvable:$true] %s117_s5 }
   0xa   :  { %v88_v10 = vand.u32 %v141_v6, %v86_v5  ;;  %s115_s30 = sshll.u32 %s216_s1, 4  ;;  %s217_s6 = smov 128   ;;  %s116_s30 = int_to_ptr.vmem [resolvable:$true] %s115_s30 }
   0xb   :  { %v64_v15 = vpack.c.b16 %v62_v11, %v62_v11  ;;  %s218_s7 = smov 8  }
   0xc   :  { %96 = vmatpush.bf16.msra.mxu0 %v88_v10  ;;  %147 = vmatpush.bf16.msra.mxu1 %v88_v10 }
  0x10   :  { %97 = vmatpush.bf16.msra.mxu0 %v145_v12  ;;  %148 = vmatpush.bf16.msra.mxu1 %v145_v12 }
  0x11   :  { %49 = vperm.xlu0 %157, %v40_v13  }
  0x13   :  { %142 = vmatmul.msk.bf16.vlgmr.msra.gmra.mxu0 %vm76_vm2, %v144_v14  ;;  %143 = vmatmul.msk.bf16.vlgmr.msra.gmra.mxu1 %vm76_vm2, %v64_v15 }
  0x7a   :  { %v45_v16 = vpop.permute.xlu0 %44 }
  0x7b   :  { %v55_v17 = vpop.permute.xlu1 %54 }
  0x83   :  { %v50_v22 = vpop.permute.xlu0 %49 }
  0x90   :  { %v99_v18 = vpop.f32.mrf.mxu0  ;;  %v104_v19 = vpop.f32.mrf.mxu1 }
  0x91   :  { %v100_v20 = vadd.f32 %v99_v18, %v45_v16  ;;  %v105_v21 = vadd.f32 %v104_v19, %v55_v17 }
  0x93   :  { %108 = vst [vmem:[#allocation5] sm:$0xff] %v100_v20 }
  0x94   :  { %110 = vst [vmem:[#allocation5 + $0x10] sm:$0xf] %v105_v21 }
  0x98   :  { %v101_v23 = vpop.f32.mrf.mxu0  ;;  %v106_v24 = vpop.f32.mrf.mxu1 }
  0x99   :  { %v102_v25 = vadd.f32 %v101_v23, %v50_v22 }
  0x9b   :  { %109 = vst [vmem:[#allocation5 + $0x8] sm:$0xff] %v102_v25 }
  0x9c   :  { %123 = dma.vmem_to_hbm [thread:$0]  %s116_s30, 384, %s118_s5, [#allocation4], %s217_s6, %s217_s6, %s218_s7  }
  0x9d   :  { %209 = dma.done.wait [#allocation4], 384  }
  0x9e   :  { %210 = vsyncadd [#allocation4], 4294966912 }
  0x9f   :  { %128 = vsyncpa [#allocation3], 1 }
  0xa0   :  { %129 = vsyncpa [#allocation4], 1 }

</bundles_post_ra>
